<compile_context>
chip_gen: v6e
topology: v6e:2x2x1
jax: 0.10.0
libtpu: 0.0.40
codegen_flags: <defaults>
</compile_context>

<pallas_src>
import jax
import jax.numpy as jnp
from jax.experimental import pallas as pl
from jax.experimental.pallas import tpu as pltpu


def _round_up(x, m):
    return ((x + m - 1) // m) * m


def mlp_kernel(x_ref, w1_ref, b1_ref, w2_ref, b2_ref, w3_ref, b3_ref, o_ref):
    # ---- layer 1: Linear(F, 512) + ReLU  (bf16 MXU, f32 accumulate) ----
    h1 = jnp.dot(x_ref[...], w1_ref[...], preferred_element_type=jnp.float32)
    h1 = jnp.maximum(h1 + b1_ref[...], 0.0)
    # batchnorm1: folded into w2/b2 at wrapper time; dropout: identity (eval)

    # ---- layer 2: Linear(512, 256) + ReLU ----
    h2 = jnp.dot(h1.astype(jnp.bfloat16), w2_ref[...],
                 preferred_element_type=jnp.float32)
    h2 = jnp.maximum(h2 + b2_ref[...], 0.0)
    # batchnorm2: folded into w3/b3 at wrapper time; dropout: identity (eval)

    # ---- output layer: Linear(256, 1) + sigmoid ----
    # N=1 matmul wastes the MXU; VPU multiply + XLU lane reduction instead.
    logits = jnp.sum(h2 * w3_ref[...], axis=-1, keepdims=True) + b3_ref[...]
    o_ref[...] = jax.nn.sigmoid(logits)


def _choose_batch_tile(B, tb):
    """Pick a row tile: big enough to amortize per-step overhead, a multiple of
    256 when possible, and keep >= 2 grid steps so v7x's 2 TCs both get work."""
    B8 = _round_up(B, 8)
    if B8 <= 256:
        return B8                       # single small tile, grid=(1,)
    TB = min(_round_up(tb, 256), _round_up(B8, 256))
    while TB >= 512 and pl.cdiv(B8, TB) < 2:
        TB //= 2
    return TB


def mlp_forward(x, params, *, tb=2048):
    """x: (B, F) float32. Returns (B,) float32 probabilities (matches torch .squeeze())."""
    B, F = x.shape
    w1 = params["w1"]

    # Zero-pad the feature dim up to a lane multiple (128) so the x block is
    # lane-dense; zero rows in w1 keep the matmul exact.
    F_pad = _round_up(F, 128)
    if w1.shape[0] != F_pad:
        w1 = jnp.pad(w1, ((0, F_pad - w1.shape[0]), (0, 0)))

    TB = _choose_batch_tile(B, tb)
    B_pad = _round_up(B, TB)

    x_bf = x.astype(jnp.bfloat16)
    if (B_pad, F_pad) != (B, F):
        x_bf = jnp.pad(x_bf, ((0, B_pad - B), (0, F_pad - F)))

    grid = (B_pad // TB,)
    const = lambda i: (0, 0)      # weights/biases stay VMEM-resident across steps

    flops = 2 * B_pad * (F_pad * 512 + 512 * 256 + 256)
    bytes_accessed = (B_pad * F_pad * 2 + B_pad * 4              # x in, out
                      + F_pad * 512 * 2 + 512 * 256 * 2          # w1, w2 (bf16)
                      + (512 + 256 + 256 + 1) * 4)               # biases + w3 row

    out = pl.pallas_call(
        mlp_kernel,
        out_shape=jax.ShapeDtypeStruct((B_pad, 1), jnp.float32),
        grid=grid,
        in_specs=[
            pl.BlockSpec((TB, F_pad), lambda i: (i, 0)),     # x  (streamed per tile)
            pl.BlockSpec((F_pad, 512), const),               # w1 (bf16, resident)
            pl.BlockSpec((1, 512), const),                   # b1
            pl.BlockSpec((512, 256), const),                 # w2 (bf16, BN1-folded)
            pl.BlockSpec((1, 256), const),                   # b2 (BN1-folded)
            pl.BlockSpec((1, 256), const),                   # w3 as row (BN2-folded)
            pl.BlockSpec((1, 1), const),                     # b3 (BN2-folded)
        ],
        out_specs=pl.BlockSpec((TB, 1), lambda i: (i, 0)),
        compiler_params=pltpu.CompilerParams(
            dimension_semantics=("parallel",),
            # Big tiles + double-buffered x/out need more than the 16/32 MiB
            # scoped defaults; 48 MiB fits every chip (v7x has 64 MiB per TC).
            vmem_limit_bytes=48 * 1024 * 1024,
        ),
        cost_estimate=pl.CostEstimate(
            flops=flops, transcendentals=B_pad, bytes_accessed=bytes_accessed),
    )(x_bf, w1, params["b1"], params["w2"], params["b2"],
      params["w3_row"], params["b3"])

    return out[:B, 0]  # drop padding rows; squeeze last dim


def make_params(key, num_features):
    """Deterministic init mimicking PyTorch defaults, with eval-mode BN folded in."""
    ks = jax.random.split(key, 6)

    def linear(kw, kb, fan_in, fan_out):
        bound = 1.0 / jnp.sqrt(jnp.float32(fan_in))
        w = jax.random.uniform(kw, (fan_in, fan_out), jnp.float32, -bound, bound)
        b = jax.random.uniform(kb, (1, fan_out), jnp.float32, -bound, bound)
        return w, b

    w1, b1 = linear(ks[0], ks[1], num_features, 512)
    w2, b2 = linear(ks[2], ks[3], 512, 256)
    w3, b3 = linear(ks[4], ks[5], 256, 1)

    def bn_affine(dim, eps=1e-5):
        # PyTorch defaults: gamma=1, beta=0, running_mean=0, running_var=1
        gamma = jnp.ones((1, dim), jnp.float32)
        beta = jnp.zeros((1, dim), jnp.float32)
        mean = jnp.zeros((1, dim), jnp.float32)
        var = jnp.ones((1, dim), jnp.float32)
        scale = gamma / jnp.sqrt(var + eps)
        shift = beta - mean * scale
        return scale, shift

    s1, t1 = bn_affine(512)
    s2, t2 = bn_affine(256)

    # Fold BN (exact affine in eval mode, applied after ReLU) into the *next* layer:
    #   (h*s + t) @ W + b  ==  h @ (diag(s) W) + (t @ W + b)
    w2_f = w2 * s1.T            # (512, 256)
    b2_f = b2 + t1 @ w2         # (1, 256)
    w3_f = w3 * s2.T            # (256, 1)
    b3_f = b3 + t2 @ w3         # (1, 1)

    return dict(
        w1=w1.astype(jnp.bfloat16),
        b1=b1,                                    # f32 (VPU math)
        w2=w2_f.astype(jnp.bfloat16),
        b2=b2_f,
        w3_row=w3_f.T.astype(jnp.float32),        # (1, 256) row for VPU reduction
        b3=b3_f,
    )


if __name__ == "__main__":
    num_features = 32
    batch = 8

    key = jax.random.PRNGKey(0)
    k_x, k_p = jax.random.split(key)
    x = jax.random.normal(k_x, (batch, num_features), jnp.float32)
    params = make_params(k_p, num_features)

    out = mlp_forward(x, params)
    jax.block_until_ready(out)

    # sanity: shape (B,), probabilities in (0, 1)
    assert out.shape == (batch,)
    assert bool(jnp.all((out > 0.0) & (out < 1.0)))

    print("KERNEL_OK")
</pallas_src>

<mosaic_0001>
module attributes {stable_mosaic.version = 11 : i64} {
  func.func @mlp_kernel(%arg0: i32, %arg1: memref<8x128xbf16, #tpu.memory_space<vmem>>, %arg2: memref<128x512xbf16, #tpu.memory_space<vmem>>, %arg3: memref<1x512xf32, #tpu.memory_space<vmem>>, %arg4: memref<512x256xbf16, #tpu.memory_space<vmem>>, %arg5: memref<1x256xf32, #tpu.memory_space<vmem>>, %arg6: memref<1x256xf32, #tpu.memory_space<vmem>>, %arg7: memref<1x1xf32, #tpu.memory_space<vmem>>, %arg8: memref<8x1xf32, #tpu.memory_space<vmem>>) attributes {dimension_semantics = [#tpu.dimension_semantics<parallel>], iteration_bounds = array<i64: 1>, scalar_prefetch = 0 : i64, scratch_operands = 0 : i64, tpu.core_type = #tpu.core_type<tc>, window_params = [{transform_indices = @transform_0, window_bounds = array<i64: 8, 128>}, {pipeline_mode = #tpu.pipeline_mode<synchronous>, transform_indices = @transform_1, window_bounds = array<i64: 128, 512>}, {pipeline_mode = #tpu.pipeline_mode<synchronous>, transform_indices = @transform_2, window_bounds = array<i64: 1, 512>}, {pipeline_mode = #tpu.pipeline_mode<synchronous>, transform_indices = @transform_3, window_bounds = array<i64: 512, 256>}, {pipeline_mode = #tpu.pipeline_mode<synchronous>, transform_indices = @transform_4, window_bounds = array<i64: 1, 256>}, {pipeline_mode = #tpu.pipeline_mode<synchronous>, transform_indices = @transform_5, window_bounds = array<i64: 1, 256>}, {pipeline_mode = #tpu.pipeline_mode<synchronous>, transform_indices = @transform_6, window_bounds = array<i64: 1, 1>}, {transform_indices = @transform_7, window_bounds = array<i64: 8, 1>}]} {
    %c0 = arith.constant 0 : index
    %c0_0 = arith.constant 0 : index
    %0 = vector.load %arg1[%c0, %c0_0] : memref<8x128xbf16, #tpu.memory_space<vmem>>, vector<8x128xbf16>
    %c0_1 = arith.constant 0 : index
    %c0_2 = arith.constant 0 : index
    %1 = vector.load %arg2[%c0_1, %c0_2] : memref<128x512xbf16, #tpu.memory_space<vmem>>, vector<128x512xbf16>
    %cst = arith.constant dense<0.000000e+00> : vector<8x512xf32>
    %2 = tpu.matmul %0, %1, %cst {dimension_numbers = #tpu.dot_dimension_numbers<[1], [0], [0], [1], [0, 0, 1, 1], [], []>} : vector<8x128xbf16>, vector<128x512xbf16>, vector<8x512xf32> -> vector<8x512xf32>
    %c0_3 = arith.constant 0 : index
    %c0_4 = arith.constant 0 : index
    %3 = vector.load %arg3[%c0_3, %c0_4] : memref<1x512xf32, #tpu.memory_space<vmem>>, vector<1x512xf32>
    %4 = vector.broadcast %3 : vector<1x512xf32> to vector<8x512xf32>
    %5 = arith.addf %2, %4 : vector<8x512xf32>
    %cst_5 = arith.constant 0.000000e+00 : f32
    %6 = vector.broadcast %cst_5 : f32 to vector<8x512xf32>
    %7 = arith.maximumf %5, %6 : vector<8x512xf32>
    %8 = arith.truncf %7 : vector<8x512xf32> to vector<8x512xbf16>
    %c0_6 = arith.constant 0 : index
    %c0_7 = arith.constant 0 : index
    %9 = vector.load %arg4[%c0_6, %c0_7] : memref<512x256xbf16, #tpu.memory_space<vmem>>, vector<512x256xbf16>
    %cst_8 = arith.constant dense<0.000000e+00> : vector<8x256xf32>
    %10 = tpu.matmul %8, %9, %cst_8 {dimension_numbers = #tpu.dot_dimension_numbers<[1], [0], [0], [1], [0, 0, 1, 1], [], []>} : vector<8x512xbf16>, vector<512x256xbf16>, vector<8x256xf32> -> vector<8x256xf32>
    %c0_9 = arith.constant 0 : index
    %c0_10 = arith.constant 0 : index
    %11 = vector.load %arg5[%c0_9, %c0_10] : memref<1x256xf32, #tpu.memory_space<vmem>>, vector<1x256xf32>
    %12 = vector.broadcast %11 : vector<1x256xf32> to vector<8x256xf32>
    %13 = arith.addf %10, %12 : vector<8x256xf32>
    %cst_11 = arith.constant 0.000000e+00 : f32
    %14 = vector.broadcast %cst_11 : f32 to vector<8x256xf32>
    %15 = arith.maximumf %13, %14 : vector<8x256xf32>
    %c0_12 = arith.constant 0 : index
    %c0_13 = arith.constant 0 : index
    %16 = vector.load %arg6[%c0_12, %c0_13] : memref<1x256xf32, #tpu.memory_space<vmem>>, vector<1x256xf32>
    %17 = vector.broadcast %16 : vector<1x256xf32> to vector<8x256xf32>
    %18 = arith.mulf %15, %17 : vector<8x256xf32>
    %cst_14 = arith.constant dense<0.000000e+00> : vector<8xf32>
    %19 = vector.multi_reduction <add>, %18, %cst_14 [1] : vector<8x256xf32> to vector<8xf32>
    %20 = vector.shape_cast %19 : vector<8xf32> to vector<8x1xf32>
    %c0_15 = arith.constant 0 : index
    %c0_16 = arith.constant 0 : index
    %21 = vector.load %arg7[%c0_15, %c0_16] : memref<1x1xf32, #tpu.memory_space<vmem>>, vector<1x1xf32>
    %22 = vector.broadcast %21 : vector<1x1xf32> to vector<8x1xf32>
    %23 = arith.addf %20, %22 : vector<8x1xf32>
    %24 = arith.negf %23 : vector<8x1xf32>
    %25 = math.exp %24 : vector<8x1xf32>
    %cst_17 = arith.constant 1.000000e+00 : f32
    %26 = vector.broadcast %cst_17 : f32 to vector<8x1xf32>
    %27 = arith.addf %26, %25 : vector<8x1xf32>
    %28 = arith.divf %26, %27 : vector<8x1xf32>
    %c0_18 = arith.constant 0 : index
    %c0_19 = arith.constant 0 : index
    %29 = vector.load %arg8[%c0_18, %c0_19] : memref<8x1xf32, #tpu.memory_space<vmem>>, vector<8x1xf32>
    tpu.vector_store %arg8[%c0_18, %c0_19], %28 {strides = array<i32>} : memref<8x1xf32, #tpu.memory_space<vmem>>, vector<8x1xf32>,
    return
  }
  func.func @transform_0(%arg0: i32) -> (i32, i32) {
    %c0_i32 = arith.constant 0 : i32
    %c0_i32_0 = arith.constant 0 : i32
    return %arg0, %c0_i32 : i32, i32
  }
  func.func @transform_1(%arg0: i32) -> (i32, i32) {
    %c0_i32 = arith.constant 0 : i32
    %c0_i32_0 = arith.constant 0 : i32
    %c0_i32_1 = arith.constant 0 : i32
    return %c0_i32, %c0_i32_0 : i32, i32
  }
  func.func @transform_2(%arg0: i32) -> (i32, i32) {
    %c0_i32 = arith.constant 0 : i32
    %c0_i32_0 = arith.constant 0 : i32
    %c0_i32_1 = arith.constant 0 : i32
    return %c0_i32, %c0_i32_0 : i32, i32
  }
  func.func @transform_3(%arg0: i32) -> (i32, i32) {
    %c0_i32 = arith.constant 0 : i32
    %c0_i32_0 = arith.constant 0 : i32
    %c0_i32_1 = arith.constant 0 : i32
    return %c0_i32, %c0_i32_0 : i32, i32
  }
  func.func @transform_4(%arg0: i32) -> (i32, i32) {
    %c0_i32 = arith.constant 0 : i32
    %c0_i32_0 = arith.constant 0 : i32
    %c0_i32_1 = arith.constant 0 : i32
    return %c0_i32, %c0_i32_0 : i32, i32
  }
  func.func @transform_5(%arg0: i32) -> (i32, i32) {
    %c0_i32 = arith.constant 0 : i32
    %c0_i32_0 = arith.constant 0 : i32
    %c0_i32_1 = arith.constant 0 : i32
    return %c0_i32, %c0_i32_0 : i32, i32
  }
  func.func @transform_6(%arg0: i32) -> (i32, i32) {
    %c0_i32 = arith.constant 0 : i32
    %c0_i32_0 = arith.constant 0 : i32
    %c0_i32_1 = arith.constant 0 : i32
    return %c0_i32, %c0_i32_0 : i32, i32
  }
  func.func @transform_7(%arg0: i32) -> (i32, i32) {
    %c0_i32 = arith.constant 0 : i32
    %c0_i32_0 = arith.constant 0 : i32
    return %arg0, %c0_i32 : i32, i32
  }
}

</mosaic_0001>

<bundles_post_ra>
// kernel: tpu_custom_call.1
= control target key start
LH: loop header
LB: loop body
LE: loop exit
PB: predicated region body
PF: predicated region fallthrough
CT: control target
= control target key end

     0   :  { %s1282_s0 = inlined_call_operand.hbm [shape: bf16[8,128], index: 0, kind: input, shape index: {}]   ;;  %s1283_s1 = inlined_call_operand.hbm [shape: bf16[128,512], index: 1, kind: input, shape index: {}]   ;;  %s1284_s2 = inlined_call_operand.vmem [shape: f32[1,512], index: 2, kind: input, shape index: {}]   ;;  %s1285_s3 = inlined_call_operand.hbm [shape: bf16[512,256], index: 3, kind: input, shape index: {}]   ;;  %s1286_s4 = inlined_call_operand.vmem [shape: f32[1,256], index: 4, kind: input, shape index: {}]   ;;  %s1287_s5 = inlined_call_operand.vmem [shape: f32[1,256], index: 5, kind: input, shape index: {}]   ;;  %s1288_s6 = inlined_call_operand.<no memory space> [shape: f32[1,1], index: 6, kind: input, shape index: {}]   ;;  %s1289_s7 = inlined_call_operand.vmem [shape: f32[8,1], index: 7, kind: output, shape index: {}]  }
   0x1   :  { %v12_v0 = vstv %s1288_s6 }
   0x2   :  { %13 = vst [vmem:[#allocation2] sm:$0x1] %v12_v0 }
   0x3   :  { %14 = vsyncpa [#allocation4], 0 }
   0x4   :  { %15 = vsyncpa [#allocation6], 0  ;;  %s1210_s26 = smov [#allocation5]  }
   0x5   :  { %s31_s27 = sshll.u32 %s1210_s26, 4  ;;  %s32_s27 = int_to_ptr.vmem [resolvable:$true] %s31_s27 }
   0x6   :  { %s1154_s28 = scalar_lea.vmem %s32_s27, 4096  ;;  %p1159_p1 = scmp.lt.s32.totalorder %s32_s27, %s32_s27 }
   0x7   :  { %p1155_p0 = scmp.ne.s32.totalorder %s32_s27, %s1154_s28  ;;  %p1160_p2 = scmp.lt.s32.totalorder %s1154_s28, %s1154_s28 }
   0x9   :  { %p1161_p3 = por %p1160_p2, %p1159_p1 }
   0xb   :  { %p1162_p4 = pnand %p1161_p3, %p1155_p0 }
   0xd   :  { %1165 = shalt.err (!%p1162_p4)
}
   0xe   :  { %s1211_s29 = smov 256   ;;  %s1212_s30 = smov 16  }
   0xf   :  { %37 = dma.hbm_to_vmem [thread:$0]  %s1283_s1, 4096, %s32_s27, [#allocation6], %s1211_s29, %s1211_s29, %s1212_s30  }
  0x10   :  { %s1213_s6 = smov [#allocation3]   ;;  %s1214_s11 = smov [#allocation7]  }
  0x11   :  { %s22_s10 = sshll.u32 %s1213_s6, 4  ;;  %s45_s12 = sshll.u32 %s1214_s11, 4  ;;  %s23_s10 = int_to_ptr.vmem [resolvable:$true] %s22_s10  ;;  %s46_s12 = int_to_ptr.vmem [resolvable:$true] %s45_s12 }
  0x12   :  { %s1174_s13 = scalar_lea.vmem %s23_s10, 64  ;;  %p1179_p6 = scmp.lt.s32.totalorder %s23_s10, %s23_s10 }
  0x13   :  { %p1175_p5 = scmp.ne.s32.totalorder %s23_s10, %s1174_s13  ;;  %p1180_p7 = scmp.lt.s32.totalorder %s1174_s13, %s1174_s13 }
  0x15   :  { %p1181_p8 = por %p1180_p7, %p1179_p6 }
  0x17   :  { %p1182_p9 = pnand %p1181_p8, %p1175_p5 }
  0x19   :  { %1185 = shalt.err (!%p1182_p9)
}
  0x1a   :  { %25 = dma.hbm_to_vmem [thread:$0]  %s1282_s0, 64, %s23_s10, [#allocation4]  }
  0x1b   :  { %s1194_s16 = scalar_lea.vmem %s46_s12, 8192  ;;  %p1199_p11 = scmp.lt.s32.totalorder %s46_s12, %s46_s12 }
  0x1c   :  { %p1195_p10 = scmp.ne.s32.totalorder %s46_s12, %s1194_s16  ;;  %p1200_p12 = scmp.lt.s32.totalorder %s1194_s16, %s1194_s16 }
  0x1e   :  { %p1201_p13 = por %p1200_p12, %p1199_p11 }
  0x20   :  { %p1202_p0 = pnand %p1201_p13, %p1195_p10 }
  0x22   :  { %1205 = shalt.err (!%p1202_p0)
}
  0x23   :  { %s1215_s1 = smov 128   ;;  %s1216_s17 = smov 8  }
  0x24   :  { %51 = dma.hbm_to_vmem [thread:$0]  %s1285_s3, 8192, %s46_s12, [#allocation6], %s1215_s1, %s1215_s1, %s1216_s17  }
  0x25   :  { %1206 = dma.done.wait [#allocation4], 64  }
  0x26   :  { %1207 = vsyncadd [#allocation4], 4294967232 }
  0x27   :  { %1208 = dma.done.wait [#allocation6], 12288  }
  0x28   :  { %1209 = vsyncadd [#allocation6], 4294955008  ;;  %v1217_v1 = vmov 0   ;;  %v998_v2 = vld [vmem:[#allocation5 + $0xe4] ss:$16 sps:$4 sm:$0xff]   ;;  %vm884_vm0 = vcmask 7168  }
  0x29   :  { %315 = vmatprep.mubr.bf16.mxu0 %v1217_v1  ;;  %356 = vmatprep.mubr.bf16.mxu1 %v1217_v1  ;;  %v1000_v3 = vld [vmem:[#allocation5 + $0xec] ss:$16 sps:$4 sm:$0xff]   ;;  %v1002_v4 = vld [vmem:[#allocation5 + $0xe0] ss:$16 sps:$4 sm:$0xff]   ;;  %v1003_v5 = vld [vmem:[#allocation5 + $0xe8] ss:$16 sps:$4 sm:$0xff]  }
  0x2a   :  { %283 = vmatprep.subr.bf16.mxu0 %v998_v2  ;;  %324 = vmatprep.subr.bf16.mxu1 %v1000_v3  ;;  %v1004_v6 = vld [vmem:[#allocation5 + $0xc4] ss:$16 sps:$4 sm:$0xff]   ;;  %v1006_v7 = vld [vmem:[#allocation5 + $0xcc] ss:$16 sps:$4 sm:$0xff]   ;;  %v1008_v8 = vld [vmem:[#allocation5 + $0xc0] ss:$16 sps:$4 sm:$0xff]  }
  0x2b   :  { %284 = vmatpush1.bf16.msra.mxu0 %v1002_v4  ;;  %325 = vmatpush1.bf16.msra.mxu1 %v1003_v5  ;;  %v1009_v9 = vld [vmem:[#allocation5 + $0xc8] ss:$16 sps:$4 sm:$0xff]   ;;  %v1010_v10 = vld [vmem:[#allocation5 + $0xa4] ss:$16 sps:$4 sm:$0xff]   ;;  %v1012_v11 = vld [vmem:[#allocation5 + $0xac] ss:$16 sps:$4 sm:$0xff]  }
  0x2c   :  { %285 = vmatprep.subr.bf16.mxu0 %v1004_v6  ;;  %326 = vmatprep.subr.bf16.mxu1 %v1006_v7  ;;  %v1014_v12 = vld [vmem:[#allocation5 + $0xa0] ss:$16 sps:$4 sm:$0xff]   ;;  %v1015_v13 = vld [vmem:[#allocation5 + $0xa8] ss:$16 sps:$4 sm:$0xff]   ;;  %v1016_v14 = vld [vmem:[#allocation5 + $0x84] ss:$16 sps:$4 sm:$0xff]  }
  0x2d   :  { %v1018_v15 = vld [vmem:[#allocation5 + $0x8c] ss:$16 sps:$4 sm:$0xff]   ;;  %v1020_v16 = vld [vmem:[#allocation5 + $0x80] ss:$16 sps:$4 sm:$0xff]   ;;  %v1021_v17 = vld [vmem:[#allocation5 + $0x88] ss:$16 sps:$4 sm:$0xff]  }
  0x2e   :  { %v1022_v18 = vld [vmem:[#allocation5 + $0x64] ss:$16 sps:$4 sm:$0xff]   ;;  %v1024_v19 = vld [vmem:[#allocation5 + $0x6c] ss:$16 sps:$4 sm:$0xff]   ;;  %v1026_v20 = vld [vmem:[#allocation5 + $0x60] ss:$16 sps:$4 sm:$0xff]  }
  0x2f   :  { %286 = vmatpush1.bf16.msra.mxu0 %v1008_v8  ;;  %327 = vmatpush1.bf16.msra.mxu1 %v1009_v9  ;;  %v1027_v21 = vld [vmem:[#allocation5 + $0x68] ss:$16 sps:$4 sm:$0xff]   ;;  %v1028_v22 = vld [vmem:[#allocation5 + $0x44] ss:$16 sps:$4 sm:$0xff]   ;;  %v1030_v23 = vld [vmem:[#allocation5 + $0x4c] ss:$16 sps:$4 sm:$0xff]  }
  0x30   :  { %287 = vmatprep.subr.bf16.mxu0 %v1010_v10  ;;  %328 = vmatprep.subr.bf16.mxu1 %v1012_v11  ;;  %v1032_v24 = vld [vmem:[#allocation5 + $0x40] ss:$16 sps:$4 sm:$0xff]   ;;  %v1033_v25 = vld [vmem:[#allocation5 + $0x48] ss:$16 sps:$4 sm:$0xff]   ;;  %v1034_v26 = vld [vmem:[#allocation5 + $0x24] ss:$16 sps:$4 sm:$0xff]  }
  0x31   :  { %v1036_v27 = vld [vmem:[#allocation5 + $0x2c] ss:$16 sps:$4 sm:$0xff]   ;;  %v1038_v28 = vld [vmem:[#allocation5 + $0x20] ss:$16 sps:$4 sm:$0xff]   ;;  %v1039_v29 = vld [vmem:[#allocation5 + $0x28] ss:$16 sps:$4 sm:$0xff]  }
  0x32   :  { %v1040_v30 = vld [vmem:[#allocation5 + $0x4] ss:$16 sps:$4 sm:$0xff]   ;;  %v1042_v31 = vld [vmem:[#allocation5 + $0xc] ss:$16 sps:$4 sm:$0xff]   ;;  %v1044_v32 = vld [vmem:[#allocation5] ss:$16 sps:$4 sm:$0xff]  }
  0x33   :  { %288 = vmatpush1.bf16.msra.mxu0 %v1014_v12  ;;  %329 = vmatpush1.bf16.msra.mxu1 %v1015_v13  ;;  %v1045_v33 = vld [vmem:[#allocation5 + $0x8] ss:$16 sps:$4 sm:$0xff]   ;;  %v1048_v34 = vld [vmem:[#allocation7 + $0x74] ss:$8 sps:$4 sm:$0xff]   ;;  %v1054_v39 = vld [vmem:[#allocation7 + $0x64] ss:$8 sps:$4 sm:$0xff]  }
  0x34   :  { %289 = vmatprep.subr.bf16.mxu0 %v1016_v14  ;;  %330 = vmatprep.subr.bf16.mxu1 %v1018_v15  ;;  %v1051_v35 = vld [vmem:[#allocation7 + $0x174] ss:$8 sps:$4 sm:$0xff]   ;;  %v1046_v37 = vld [vmem:[#allocation7 + $0x70] ss:$8 sps:$4 sm:$0xff]   ;;  %v1057_v40 = vld [vmem:[#allocation7 + $0x164] ss:$8 sps:$4 sm:$0xff]  }
  0x35   :  { %v68_v36 = vld [vmem:[#allocation3] sm:$0xf]  ;;  %v1049_v38 = vld [vmem:[#allocation7 + $0x170] ss:$8 sps:$4 sm:$0xff]   ;;  %v1052_v41 = vld [vmem:[#allocation7 + $0x60] ss:$8 sps:$4 sm:$0xff]  }
  0x36   :  { %v1055_v42 = vld [vmem:[#allocation7 + $0x160] ss:$8 sps:$4 sm:$0xff]   ;;  %v1060_v43 = vld [vmem:[#allocation7 + $0x54] ss:$8 sps:$4 sm:$0xff]   ;;  %v1058_v45 = vld [vmem:[#allocation7 + $0x50] ss:$8 sps:$4 sm:$0xff]  }
  0x37   :  { %290 = vmatpush1.bf16.msra.mxu0 %v1020_v16  ;;  %331 = vmatpush1.bf16.msra.mxu1 %v1021_v17  ;;  %v1063_v44 = vld [vmem:[#allocation7 + $0x154] ss:$8 sps:$4 sm:$0xff]   ;;  %v1061_v46 = vld [vmem:[#allocation7 + $0x150] ss:$8 sps:$4 sm:$0xff]   ;;  %v1066_v47 = vld [vmem:[#allocation7 + $0x44] ss:$8 sps:$4 sm:$0xff]  }
  0x38   :  { %291 = vmatprep.subr.bf16.mxu0 %v1022_v18  ;;  %332 = vmatprep.subr.bf16.mxu1 %v1024_v19  ;;  %v1069_v48 = vld [vmem:[#allocation7 + $0x144] ss:$8 sps:$4 sm:$0xff]   ;;  %v1064_v49 = vld [vmem:[#allocation7 + $0x40] ss:$8 sps:$4 sm:$0xff]   ;;  %v1072_v51 = vld [vmem:[#allocation7 + $0x34] ss:$8 sps:$4 sm:$0xff]  }
  0x39   :  { %v1067_v50 = vld [vmem:[#allocation7 + $0x140] ss:$8 sps:$4 sm:$0xff]   ;;  %v1075_v52 = vld [vmem:[#allocation7 + $0x134] ss:$8 sps:$4 sm:$0xff]   ;;  %v1070_v53 = vld [vmem:[#allocation7 + $0x30] ss:$8 sps:$4 sm:$0xff]  }
  0x3a   :  { %v1073_v54 = vld [vmem:[#allocation7 + $0x130] ss:$8 sps:$4 sm:$0xff]   ;;  %v1078_v55 = vld [vmem:[#allocation7 + $0x24] ss:$8 sps:$4 sm:$0xff]   ;;  %v1076_v57 = vld [vmem:[#allocation7 + $0x20] ss:$8 sps:$4 sm:$0xff]  }
  0x3b   :  { %292 = vmatpush1.bf16.msra.mxu0 %v1026_v20  ;;  %333 = vmatpush1.bf16.msra.mxu1 %v1027_v21  ;;  %v1081_v56 = vld [vmem:[#allocation7 + $0x124] ss:$8 sps:$4 sm:$0xff]   ;;  %v1079_v58 = vld [vmem:[#allocation7 + $0x120] ss:$8 sps:$4 sm:$0xff]   ;;  %v1084_v59 = vld [vmem:[#allocation7 + $0x14] ss:$8 sps:$4 sm:$0xff]  }
  0x3c   :  { %293 = vmatprep.subr.bf16.mxu0 %v1028_v22  ;;  %334 = vmatprep.subr.bf16.mxu1 %v1030_v23  ;;  %v1087_v60 = vld [vmem:[#allocation7 + $0x114] ss:$8 sps:$4 sm:$0xff]   ;;  %v1082_v61 = vld [vmem:[#allocation7 + $0x10] ss:$8 sps:$4 sm:$0xff]   ;;  %v1090_v63 = vld [vmem:[#allocation7 + $0x4] ss:$8 sps:$4 sm:$0xff]  }
  0x3d   :  { %v1085_v62 = vld [vmem:[#allocation7 + $0x110] ss:$8 sps:$4 sm:$0xff]   ;;  %v1093_v0 = vld [vmem:[#allocation7 + $0x104] ss:$8 sps:$4 sm:$0xff]   ;;  %v1088_v1 = vld [vmem:[#allocation7] ss:$8 sps:$4 sm:$0xff]  }
  0x3e   :  { %v1091_v2 = vld [vmem:[#allocation7 + $0x100] ss:$8 sps:$4 sm:$0xff]   ;;  %v1096_v3 = vld [vmem:[#allocation7 + $0xf4] ss:$8 sps:$4 sm:$0xff]   ;;  %v1094_v5 = vld [vmem:[#allocation7 + $0xf0] ss:$8 sps:$4 sm:$0xff]  }
  0x3f   :  { %294 = vmatpush1.bf16.msra.mxu0 %v1032_v24  ;;  %335 = vmatpush1.bf16.msra.mxu1 %v1033_v25  ;;  %v1099_v4 = vld [vmem:[#allocation7 + $0x1f4] ss:$8 sps:$4 sm:$0xff]   ;;  %v1097_v6 = vld [vmem:[#allocation7 + $0x1f0] ss:$8 sps:$4 sm:$0xff]   ;;  %v1102_v7 = vld [vmem:[#allocation7 + $0xe4] ss:$8 sps:$4 sm:$0xff]  }
  0x40   :  { %295 = vmatprep.subr.bf16.mxu0 %v1034_v26  ;;  %336 = vmatprep.subr.bf16.mxu1 %v1036_v27  ;;  %v1105_v8 = vld [vmem:[#allocation7 + $0x1e4] ss:$8 sps:$4 sm:$0xff]   ;;  %v1100_v9 = vld [vmem:[#allocation7 + $0xe0] ss:$8 sps:$4 sm:$0xff]   ;;  %v1108_v11 = vld [vmem:[#allocation7 + $0xd4] ss:$8 sps:$4 sm:$0xff]  }
  0x41   :  { %v1103_v10 = vld [vmem:[#allocation7 + $0x1e0] ss:$8 sps:$4 sm:$0xff]   ;;  %v1111_v12 = vld [vmem:[#allocation7 + $0x1d4] ss:$8 sps:$4 sm:$0xff]   ;;  %v1106_v13 = vld [vmem:[#allocation7 + $0xd0] ss:$8 sps:$4 sm:$0xff]  }
  0x42   :  { %v1109_v14 = vld [vmem:[#allocation7 + $0x1d0] ss:$8 sps:$4 sm:$0xff]   ;;  %v1114_v15 = vld [vmem:[#allocation7 + $0xc4] ss:$8 sps:$4 sm:$0xff]   ;;  %v1112_v17 = vld [vmem:[#allocation7 + $0xc0] ss:$8 sps:$4 sm:$0xff]  }
  0x43   :  { %296 = vmatpush1.bf16.msra.mxu0 %v1038_v28  ;;  %337 = vmatpush1.bf16.msra.mxu1 %v1039_v29  ;;  %v1117_v16 = vld [vmem:[#allocation7 + $0x1c4] ss:$8 sps:$4 sm:$0xff]   ;;  %v1115_v18 = vld [vmem:[#allocation7 + $0x1c0] ss:$8 sps:$4 sm:$0xff]   ;;  %v1120_v19 = vld [vmem:[#allocation7 + $0xb4] ss:$8 sps:$4 sm:$0xff]  }
  0x44   :  { %297 = vmatprep.subr.bf16.mxu0 %v1040_v30  ;;  %338 = vmatprep.subr.bf16.mxu1 %v1042_v31  ;;  %v1123_v20 = vld [vmem:[#allocation7 + $0x1b4] ss:$8 sps:$4 sm:$0xff]   ;;  %v1118_v21 = vld [vmem:[#allocation7 + $0xb0] ss:$8 sps:$4 sm:$0xff]   ;;  %v1126_v23 = vld [vmem:[#allocation7 + $0xa4] ss:$8 sps:$4 sm:$0xff]  }
  0x45   :  { %v1121_v22 = vld [vmem:[#allocation7 + $0x1b0] ss:$8 sps:$4 sm:$0xff]   ;;  %v1129_v24 = vld [vmem:[#allocation7 + $0x1a4] ss:$8 sps:$4 sm:$0xff]   ;;  %v1124_v25 = vld [vmem:[#allocation7 + $0xa0] ss:$8 sps:$4 sm:$0xff]  }
  0x46   :  { %v1127_v26 = vld [vmem:[#allocation7 + $0x1a0] ss:$8 sps:$4 sm:$0xff]   ;;  %v1132_v27 = vld [vmem:[#allocation7 + $0x94] ss:$8 sps:$4 sm:$0xff]   ;;  %v1130_v29 = vld [vmem:[#allocation7 + $0x90] ss:$8 sps:$4 sm:$0xff]  }
  0x47   :  { %298 = vmatpush1.bf16.msra.mxu0 %v1044_v32  ;;  %339 = vmatpush1.bf16.msra.mxu1 %v1045_v33  ;;  %v1135_v28 = vld [vmem:[#allocation7 + $0x194] ss:$8 sps:$4 sm:$0xff]   ;;  %v1133_v30 = vld [vmem:[#allocation7 + $0x190] ss:$8 sps:$4 sm:$0xff]   ;;  %v1138_v31 = vld [vmem:[#allocation7 + $0x84] ss:$8 sps:$4 sm:$0xff]  }
  0x48   :  { %769 = vmatprep.subr.bf16.mxu0 %v1048_v34  ;;  %810 = vmatprep.subr.bf16.mxu1 %v1051_v35  ;;  %v1141_v32 = vld [vmem:[#allocation7 + $0x184] ss:$8 sps:$4 sm:$0xff]   ;;  %v1136_v33 = vld [vmem:[#allocation7 + $0x80] ss:$8 sps:$4 sm:$0xff]   ;;  %v103_v35 = vlaneseq }
  0x49   :  { %v1139_v34 = vld [vmem:[#allocation7 + $0x180] ss:$8 sps:$4 sm:$0xff]  }
  0x4a   :  { %316 = vmatmul.mubr.bf16.vlgmr.msra.gmra.mxu0 %v68_v36  ;;  %357 = vmatmul.mubr.bf16.vlgmr.msra.gmra.mxu1 %v68_v36  ;;  %v104_v36 = vshrl.u32 %v103_v35, 7 }
  0x4b   :  { %770 = vmatpush1.bf16.msra.mxu0 %v1046_v37  ;;  %811 = vmatpush1.bf16.msra.mxu1 %v1049_v38 }
  0x4c   :  { %771 = vmatprep.subr.bf16.mxu0 %v1054_v39  ;;  %812 = vmatprep.subr.bf16.mxu1 %v1057_v40  ;;  %v105_v37 = vsub.s32 0, %v104_v36  ;;  %v113_v38 = vsub.s32 2, %v104_v36  ;;  %v101_v39 = vld [vmem:[%s1284_s2] sm:$0xf]  ;;  %v109_v40 = vsub.s32 1, %v104_v36 }
  0x4f   :  { %772 = vmatpush1.bf16.msra.mxu0 %v1052_v41  ;;  %813 = vmatpush1.bf16.msra.mxu1 %v1055_v42  ;;  %v117_v41 = vsub.s32 3, %v104_v36  ;;  %v106_v42 = vrot.slane %v101_v39, %v105_v37 }
  0x50   :  { %773 = vmatprep.subr.bf16.mxu0 %v1060_v43  ;;  %814 = vmatprep.subr.bf16.mxu1 %v1063_v44  ;;  %v114_v43 = vrot.slane %v101_v39, %v113_v38  ;;  %v110_v44 = vrot.slane %v101_v39, %v109_v40 }
  0x53   :  { %774 = vmatpush1.bf16.msra.mxu0 %v1058_v45  ;;  %815 = vmatpush1.bf16.msra.mxu1 %v1061_v46  ;;  %v118_v45 = vrot.slane %v101_v39, %v117_v41 }
  0x54   :  { %775 = vmatprep.subr.bf16.mxu0 %v1066_v47  ;;  %816 = vmatprep.subr.bf16.mxu1 %v1069_v48 }
  0x57   :  { %776 = vmatpush1.bf16.msra.mxu0 %v1064_v49  ;;  %817 = vmatpush1.bf16.msra.mxu1 %v1067_v50 }
  0x58   :  { %777 = vmatprep.subr.bf16.mxu0 %v1072_v51  ;;  %818 = vmatprep.subr.bf16.mxu1 %v1075_v52 }
  0x5b   :  { %778 = vmatpush1.bf16.msra.mxu0 %v1070_v53  ;;  %819 = vmatpush1.bf16.msra.mxu1 %v1073_v54 }
  0x5c   :  { %779 = vmatprep.subr.bf16.mxu0 %v1078_v55  ;;  %820 = vmatprep.subr.bf16.mxu1 %v1081_v56 }
  0x5f   :  { %780 = vmatpush1.bf16.msra.mxu0 %v1076_v57  ;;  %821 = vmatpush1.bf16.msra.mxu1 %v1079_v58 }
  0x60   :  { %781 = vmatprep.subr.bf16.mxu0 %v1084_v59  ;;  %822 = vmatprep.subr.bf16.mxu1 %v1087_v60 }
  0x63   :  { %782 = vmatpush1.bf16.msra.mxu0 %v1082_v61  ;;  %823 = vmatpush1.bf16.msra.mxu1 %v1085_v62 }
  0x64   :  { %783 = vmatprep.subr.bf16.mxu0 %v1090_v63  ;;  %824 = vmatprep.subr.bf16.mxu1 %v1093_v0 }
  0x67   :  { %784 = vmatpush1.bf16.msra.mxu0 %v1088_v1  ;;  %825 = vmatpush1.bf16.msra.mxu1 %v1091_v2  ;;  %v437_v2 = vld [vmem:[%s1286_s4] sm:$0x3] }
  0x68   :  { %785 = vmatprep.subr.bf16.mxu0 %v1096_v3  ;;  %826 = vmatprep.subr.bf16.mxu1 %v1099_v4  ;;  %v442_v3 = vrot.slane %v437_v2, %v105_v37  ;;  %v446_v4 = vrot.slane %v437_v2, %v109_v40 }
  0x6b   :  { %786 = vmatpush2.bf16.msra.mxu0 %v1094_v5  ;;  %827 = vmatpush2.bf16.msra.mxu1 %v1097_v6 }
  0x6c   :  { %787 = vmatprep.subr.bf16.mxu0 %v1102_v7  ;;  %828 = vmatprep.subr.bf16.mxu1 %v1105_v8 }
  0x6f   :  { %788 = vmatpush2.bf16.msra.mxu0 %v1100_v9  ;;  %829 = vmatpush2.bf16.msra.mxu1 %v1103_v10  ;;  %v853_v10 = vld [vmem:[%s1287_s5] sm:$0x3] }
  0x70   :  { %789 = vmatprep.subr.bf16.mxu0 %v1108_v11  ;;  %830 = vmatprep.subr.bf16.mxu1 %v1111_v12 }
  0x73   :  { %790 = vmatpush2.bf16.msra.mxu0 %v1106_v13  ;;  %831 = vmatpush2.bf16.msra.mxu1 %v1109_v14 }
  0x74   :  { %791 = vmatprep.subr.bf16.mxu0 %v1114_v15  ;;  %832 = vmatprep.subr.bf16.mxu1 %v1117_v16 }
  0x77   :  { %792 = vmatpush2.bf16.msra.mxu0 %v1112_v17  ;;  %833 = vmatpush2.bf16.msra.mxu1 %v1115_v18  ;;  %v858_v17 = vrot.slane %v853_v10, %v105_v37  ;;  %v862_v18 = vrot.slane %v853_v10, %v109_v40 }
  0x78   :  { %793 = vmatprep.subr.bf16.mxu0 %v1120_v19  ;;  %834 = vmatprep.subr.bf16.mxu1 %v1123_v20 }
  0x7b   :  { %794 = vmatpush2.bf16.msra.mxu0 %v1118_v21  ;;  %835 = vmatpush2.bf16.msra.mxu1 %v1121_v22 }
  0x7c   :  { %795 = vmatprep.subr.bf16.mxu0 %v1126_v23  ;;  %836 = vmatprep.subr.bf16.mxu1 %v1129_v24 }
  0x7f   :  { %796 = vmatpush2.bf16.msra.mxu0 %v1124_v25  ;;  %837 = vmatpush2.bf16.msra.mxu1 %v1127_v26  ;;  %v988_v25 = vld [vmem:[#allocation2] ss:$0 sm:$0xff] }
  0x80   :  { %797 = vmatprep.subr.bf16.mxu0 %v1132_v27  ;;  %838 = vmatprep.subr.bf16.mxu1 %v1135_v28 }
  0x83   :  { %798 = vmatpush2.bf16.msra.mxu0 %v1130_v29  ;;  %839 = vmatpush2.bf16.msra.mxu1 %v1133_v30 }
  0x84   :  { %799 = vmatprep.subr.bf16.mxu0 %v1138_v31  ;;  %840 = vmatprep.subr.bf16.mxu1 %v1141_v32 }
  0x87   :  { %800 = vmatpush2.bf16.msra.mxu0 %v1136_v33  ;;  %841 = vmatpush2.bf16.msra.mxu1 %v1139_v34 }
 0x10a   :  { %v317_v46 = vpop.f32.mrf.mxu0  ;;  %v358_v47 = vpop.f32.mrf.mxu1 }
 0x10b   :  { %v318_v48 = vadd.f32 %v317_v46, %v106_v42  ;;  %v359_v49 = vadd.f32 %v358_v47, %v114_v43 }
 0x10c   :  { %v319_v50 = vpop.f32.mrf.mxu0  ;;  %v360_v51 = vpop.f32.mrf.mxu1 }
 0x10d   :  { %v367_v52 = vmax.f32 %v359_v49, 0.0  ;;  %v320_v53 = vadd.f32 %v319_v50, %v110_v44  ;;  %v361_v54 = vadd.f32 %v360_v51, %v118_v45  ;;  %v365_v55 = vmax.f32 %v318_v48, 0.0 }
 0x10e   :  { %v321_v56 = vpop.f32.mrf.mxu0  ;;  %v362_v57 = vpop.f32.mrf.mxu1 }
 0x10f   :  { %v366_v58 = vmax.f32 %v320_v53, 0.0  ;;  %v368_v59 = vmax.f32 %v361_v54, 0.0  ;;  %v371_v60 = vpack.c.bf16 %v367_v52, %v367_v52  ;;  %v369_v1 = vpack.c.bf16 %v365_v55, %v365_v55 }
 0x110   :  { %v322_v61 = vpop.f32.mrf.mxu0  ;;  %v363_v62 = vpop.f32.mrf.mxu1 }
 0x111   :  { %v370_v63 = vpack.c.bf16 %v366_v58, %v366_v58  ;;  %v372_v0 = vpack.c.bf16 %v368_v59, %v368_v59 }
 0x113   :  { %801 = vmatprep.mubr.bf16.mxu0 %v370_v63  ;;  %842 = vmatprep.mubr.bf16.mxu1 %v372_v0 }
 0x114   :  { %802 = vmatmul.mubr.bf16.vlgmr.msra.gmra.mxu0 %v369_v1  ;;  %843 = vmatmul.mubr.bf16.vlgmr.msra.gmra.mxu1 %v371_v60 }
 0x1d4   :  { %v803_v5 = vpop.f32.mrf.mxu0  ;;  %v844_v6 = vpop.f32.mrf.mxu1 }
 0x1d5   :  { %v804_v7 = vadd.f32 %v803_v5, %v442_v3 }
 0x1d6   :  { %v805_v8 = vpop.f32.mrf.mxu0  ;;  %v846_v9 = vpop.f32.mrf.mxu1 }
 0x1d7   :  { %v845_v11 = vadd.f32 %v844_v6, %v804_v7  ;;  %v806_v12 = vadd.f32 %v805_v8, %v446_v4 }
 0x1d8   :  { %v807_v13 = vpop.f32.mrf.mxu0  ;;  %v848_v14 = vpop.f32.mrf.mxu1 }
 0x1d9   :  { %v851_v15 = vmax.f32 %v845_v11, 0.0  ;;  %v847_v16 = vadd.f32 %v846_v9, %v806_v12 }
 0x1da   :  { %v808_v19 = vpop.f32.mrf.mxu0  ;;  %v849_v20 = vpop.f32.mrf.mxu1 }
 0x1db   :  { %v852_v21 = vmax.f32 %v847_v16, 0.0  ;;  %v865_v22 = vmul.f32 %v858_v17, %v851_v15 }
 0x1dd   :  { %v866_v23 = vmul.f32 %v862_v18, %v852_v21 }
 0x1df   :  { %v867_v24 = vadd.f32 %v866_v23, %v865_v22 }
 0x1e1   :  { %868 = vadd.xlane.f32.xlu0 %v867_v24 }
 0x26a   :  { %v869_v26 = vpop.xlane.xlu0 %868 }
 0x26b   :  { %v877_v27 = vadd.f32 %v988_v25, %v869_v26 }
 0x26d   :  { %v989_v28 = vmul.f32 -1.442695, %v877_v27 }
 0x26f   :  { %1142 = vpow2.f32 %v989_v28 }
 0x27c   :  { %v1143_v29 = vpop.eup %1142 }
 0x27d   :  { %v881_v30 = vadd.f32 1.0, %v1143_v29 }
 0x27f   :  { %1144 = vrcp.f32 %v881_v30 }
 0x28c   :  { %v1145_v31 = vpop.eup %1144 }
 0x28d   :  { %885 = vst.msk [vmem:[%s1289_s7] sm:$0xff] %vm884_vm0, %v1145_v31 }
 0x28e   :  { %890 = vsyncpa [#allocation4], 1 }
 0x28f   :  { %891 = vsyncpa [#allocation6], 1 }

</bundles_post_ra>
